<compile_context>
chip_gen: v7x
topology: tpu7x:2x2x1
jax: 0.10.0
libtpu: 0.0.40
codegen_flags: <defaults>
</compile_context>

<pallas_src>
import functools
import math

import jax
import jax.numpy as jnp
from jax.experimental import pallas as pl
from jax.experimental.pallas import tpu as pltpu


def _round_up(a, b):
    return (a + b - 1) // b * b


def _pad2(a, rows, cols):
    return jnp.pad(a, ((0, rows - a.shape[0]), (0, cols - a.shape[1])))


def _bayes_linear_kernel(x_ref, wm_ref, wv_ref, bm_ref, bv_ref, zeta_ref,
                         o_ref, gamma_acc, delta_acc):
    k = pl.program_id(2)

    @pl.when(k == 0)
    def _init():
        gamma_acc[...] = jnp.zeros_like(gamma_acc)
        delta_acc[...] = jnp.zeros_like(delta_acc)

    x = x_ref[...]
    # mean path:     gamma += x   @ w_mean^T
    # variance path: delta += x^2 @ w_var^T     (both accumulate in f32 on MXU)
    gamma_acc[...] += jnp.dot(x, wm_ref[...], preferred_element_type=jnp.float32)
    delta_acc[...] += jnp.dot(x * x, wv_ref[...], preferred_element_type=jnp.float32)

    @pl.when(k == pl.num_programs(2) - 1)
    def _finalize():
        gamma = gamma_acc[...] + bm_ref[...]
        delta = delta_acc[...] + bv_ref[...]
        # TODO(synk): optionally generate zeta in-kernel (pltpu.prng_seed +
        # pltpu.stateful_normal) to drop the B*O*4-byte HBM read; kept external
        # here so the sample is bit-reproducible against the reference.
        o_ref[...] = (gamma + jnp.sqrt(delta) * zeta_ref[...]).astype(o_ref.dtype)


def precompute_params(w_mean, w_pho, b_mean, b_pho, compute_dtype=jnp.float32):
    """One-time parameter transform: transpose + stable softplus()**2.

    Run this once per parameter update, NOT per forward call, so the hot path
    has no per-call weight transpose or transcendental work.
    """
    wm_t = jnp.transpose(w_mean).astype(compute_dtype)                        # (I, O)
    wv_t = jnp.transpose(jax.nn.softplus(w_pho) ** 2).astype(compute_dtype)   # (I, O)
    bm = jnp.reshape(b_mean, (1, -1)).astype(jnp.float32)                     # (1, O)
    bv = jnp.reshape(jax.nn.softplus(b_pho) ** 2, (1, -1)).astype(jnp.float32)
    return wm_t, wv_t, bm, bv


@functools.partial(jax.jit, static_argnames=("tm", "tn", "tk"))
def bayesian_linear_forward(x, wm_t, wv_t, bm, bv, zeta, *, tm=128, tn=256, tk=512):
    """x: (B, I). wm_t/wv_t: (I, O) precomputed. bm/bv: (1, O). zeta: (B, O)."""
    B, I = x.shape
    Iw, O = wm_t.shape
    assert Iw == I and wv_t.shape == (I, O)
    assert bm.shape == (1, O) and bv.shape == (1, O) and zeta.shape == (B, O)

    compute_dtype = wm_t.dtype  # f32, or bf16 for the fast MXU path

    # Cap tiles at the (8,128)-aligned problem size so tiny layers don't over-pad.
    tm = min(tm, _round_up(B, 8))
    tn = min(tn, _round_up(O, 128))
    tk = min(tk, _round_up(I, 128))

    Bp, Ip, Op = _round_up(B, tm), _round_up(I, tk), _round_up(O, tn)

    # Zero padding is exact: padded inputs/weights contribute 0 to gamma/delta.
    x_p = _pad2(x.astype(compute_dtype), Bp, Ip)
    wm_p = _pad2(wm_t, Ip, Op)
    wv_p = _pad2(wv_t, Ip, Op)
    bm_p = _pad2(bm, 1, Op)
    bv_p = _pad2(bv, 1, Op)
    z_p = _pad2(zeta.astype(jnp.float32), Bp, Op)

    grid = (Bp // tm, Op // tn, Ip // tk)

    out_p = pl.pallas_call(
        _bayes_linear_kernel,
        out_shape=jax.ShapeDtypeStruct((Bp, Op), jnp.float32),
        grid_spec=pltpu.PrefetchScalarGridSpec(
            num_scalar_prefetch=0,
            grid=grid,
            in_specs=[
                pl.BlockSpec((tm, tk), lambda i, j, k: (i, k)),   # x
                pl.BlockSpec((tk, tn), lambda i, j, k: (k, j)),   # w_mean^T
                pl.BlockSpec((tk, tn), lambda i, j, k: (k, j)),   # w_var^T
                pl.BlockSpec((1, tn), lambda i, j, k: (0, j)),    # b_mean row
                pl.BlockSpec((1, tn), lambda i, j, k: (0, j)),    # b_var row
                pl.BlockSpec((tm, tn), lambda i, j, k: (i, j)),   # zeta
            ],
            out_specs=pl.BlockSpec((tm, tn), lambda i, j, k: (i, j)),
            scratch_shapes=[pltpu.VMEM((tm, tn), jnp.float32),    # gamma acc
                            pltpu.VMEM((tm, tn), jnp.float32)],   # delta acc
        ),
        compiler_params=pltpu.CompilerParams(
            dimension_semantics=("parallel", "parallel", "arbitrary"),
            vmem_limit_bytes=40 * 1024 * 1024,  # fits v7x's 64 MiB with headroom
        ),
    )(x_p, wm_p, wv_p, bm_p, bv_p, z_p)

    return out_p[:B, :O]


def _reference(x, w_mean, w_pho, b_mean, b_pho, zeta):
    w_var = jax.nn.softplus(w_pho) ** 2
    b_var = jax.nn.softplus(b_pho) ** 2
    gamma = x @ w_mean.T + b_mean.reshape(1, -1)
    delta = (x * x) @ w_var.T + b_var.reshape(1, -1)
    return gamma + jnp.sqrt(delta) * zeta


def _rel_l2(a, b):
    return float(jnp.linalg.norm(a - b) / (jnp.linalg.norm(b) + 1e-30))


if __name__ == "__main__":
    prior_std = 1.0
    std_to_pho_v = math.log(math.exp(prior_std) - 1.0)

    def make_case(key, batch, input_num, output_num):
        kx, kw, kz = jax.random.split(key, 3)
        w_mean = jax.random.normal(kw, (output_num, input_num), dtype=jnp.float32)
        w_pho = jnp.full((output_num, input_num), std_to_pho_v, dtype=jnp.float32)
        b_mean = jnp.zeros((output_num, 1), dtype=jnp.float32)
        b_pho = jnp.full((output_num, 1), std_to_pho_v, dtype=jnp.float32)
        x = jax.random.normal(kx, (batch, input_num), dtype=jnp.float32)
        zeta = jax.random.normal(kz, (batch, output_num), dtype=jnp.float32)
        return x, w_mean, w_pho, b_mean, b_pho, zeta

    key = jax.random.PRNGKey(0)
    k1, k2 = jax.random.split(key)

    # --- case 1: module's toy shapes (B=8, I=32, O=64), f32 path ---
    x, w_mean, w_pho, b_mean, b_pho, zeta = make_case(k1, 8, 32, 64)
    params = precompute_params(w_mean, w_pho, b_mean, b_pho, jnp.float32)
    out = jax.block_until_ready(bayesian_linear_forward(x, *params, zeta))
    ref = _reference(x, w_mean, w_pho, b_mean, b_pho, zeta)
    assert out.shape == ref.shape == (8, 64)
    assert jnp.allclose(out, ref, atol=1e-4, rtol=1e-4), "f32 small-case mismatch"

    # --- case 2: multi-tile grid (2,2,2): B=256, I=1024, O=512, f32 path ---
    x, w_mean, w_pho, b_mean, b_pho, zeta = make_case(k2, 256, 1024, 512)
    params = precompute_params(w_mean, w_pho, b_mean, b_pho, jnp.float32)
    out = jax.block_until_ready(bayesian_linear_forward(x, *params, zeta))
    ref = _reference(x, w_mean, w_pho, b_mean, b_pho, zeta)
    assert out.shape == ref.shape == (256, 512)
    err_f32 = _rel_l2(out, ref)
    assert err_f32 < 2e-2, f"f32 tiled-case relative error too large: {err_f32}"

    # --- case 3: same problem, bf16 MXU operands (f32 accumulation) ---
    params_bf16 = precompute_params(w_mean, w_pho, b_mean, b_pho, jnp.bfloat16)
    out_bf16 = jax.block_until_ready(bayesian_linear_forward(x, *params_bf16, zeta))
    err_bf16 = _rel_l2(out_bf16, ref)
    assert err_bf16 < 2e-2, f"bf16 path relative error too large: {err_bf16}"

    print("KERNEL_OK")
</pallas_src>

<mosaic_0001>
module attributes {stable_mosaic.version = 11 : i64} {
  func.func @_bayes_linear_kernel(%arg0: i32, %arg1: i32, %arg2: i32, %arg3: memref<8x128xf32, #tpu.memory_space<vmem>>, %arg4: memref<128x128xf32, #tpu.memory_space<vmem>>, %arg5: memref<128x128xf32, #tpu.memory_space<vmem>>, %arg6: memref<1x128xf32, #tpu.memory_space<vmem>>, %arg7: memref<1x128xf32, #tpu.memory_space<vmem>>, %arg8: memref<8x128xf32, #tpu.memory_space<vmem>>, %arg9: memref<8x128xf32, #tpu.memory_space<vmem>>, %arg10: memref<8x128xf32, #tpu.memory_space<vmem>>, %arg11: memref<8x128xf32, #tpu.memory_space<vmem>>) attributes {dimension_semantics = [#tpu.dimension_semantics<parallel>, #tpu.dimension_semantics<parallel>, #tpu.dimension_semantics<arbitrary>], iteration_bounds = array<i64: 1, 1, 1>, scalar_prefetch = 0 : i64, scratch_operands = 2 : i64, tpu.core_type = #tpu.core_type<tc>, window_params = [{transform_indices = @transform_0, window_bounds = array<i64: 8, 128>}, {transform_indices = @transform_1, window_bounds = array<i64: 128, 128>}, {transform_indices = @transform_2, window_bounds = array<i64: 128, 128>}, {transform_indices = @transform_3, window_bounds = array<i64: 1, 128>}, {transform_indices = @transform_4, window_bounds = array<i64: 1, 128>}, {transform_indices = @transform_5, window_bounds = array<i64: 8, 128>}, {transform_indices = @transform_6, window_bounds = array<i64: 8, 128>}]} {
    %c0_i32 = arith.constant 0 : i32
    %0 = arith.cmpi eq, %arg2, %c0_i32 : i32
    %1 = arith.extui %0 : i1 to i32
    %c0_i32_0 = arith.constant 0 : i32
    %2 = arith.cmpi ne, %1, %c0_i32_0 : i32
    scf.if %2 {
      %cst_17 = arith.constant 0.000000e+00 : f32
      %18 = vector.broadcast %cst_17 : f32 to vector<8x128xf32>
      %c0_18 = arith.constant 0 : index
      %c0_19 = arith.constant 0 : index
      %19 = vector.load %arg10[%c0_18, %c0_19] : memref<8x128xf32, #tpu.memory_space<vmem>>, vector<8x128xf32>
      tpu.vector_store %arg10[%c0_18, %c0_19], %18 {strides = array<i32>} : memref<8x128xf32, #tpu.memory_space<vmem>>, vector<8x128xf32>,
      %cst_20 = arith.constant 0.000000e+00 : f32
      %20 = vector.broadcast %cst_20 : f32 to vector<8x128xf32>
      %c0_21 = arith.constant 0 : index
      %c0_22 = arith.constant 0 : index
      %21 = vector.load %arg11[%c0_21, %c0_22] : memref<8x128xf32, #tpu.memory_space<vmem>>, vector<8x128xf32>
      tpu.vector_store %arg11[%c0_21, %c0_22], %20 {strides = array<i32>} : memref<8x128xf32, #tpu.memory_space<vmem>>, vector<8x128xf32>,
    } else {
    }
    %c0 = arith.constant 0 : index
    %c0_1 = arith.constant 0 : index
    %3 = vector.load %arg3[%c0, %c0_1] : memref<8x128xf32, #tpu.memory_space<vmem>>, vector<8x128xf32>
    %c0_2 = arith.constant 0 : index
    %c0_3 = arith.constant 0 : index
    %4 = vector.load %arg10[%c0_2, %c0_3] : memref<8x128xf32, #tpu.memory_space<vmem>>, vector<8x128xf32>
    %c0_4 = arith.constant 0 : index
    %c0_5 = arith.constant 0 : index
    %5 = vector.load %arg4[%c0_4, %c0_5] : memref<128x128xf32, #tpu.memory_space<vmem>>, vector<128x128xf32>
    %cst = arith.constant dense<0.000000e+00> : vector<8x128xf32>
    %6 = tpu.matmul %3, %5, %cst {dimension_numbers = #tpu.dot_dimension_numbers<[1], [0], [0], [1], [0, 0, 1, 1], [], []>} : vector<8x128xf32>, vector<128x128xf32>, vector<8x128xf32> -> vector<8x128xf32>
    %7 = arith.addf %4, %6 : vector<8x128xf32>
    %c0_6 = arith.constant 0 : index
    %c0_7 = arith.constant 0 : index
    %8 = vector.load %arg10[%c0_6, %c0_7] : memref<8x128xf32, #tpu.memory_space<vmem>>, vector<8x128xf32>
    tpu.vector_store %arg10[%c0_6, %c0_7], %7 {strides = array<i32>} : memref<8x128xf32, #tpu.memory_space<vmem>>, vector<8x128xf32>,
    %c0_8 = arith.constant 0 : index
    %c0_9 = arith.constant 0 : index
    %9 = vector.load %arg11[%c0_8, %c0_9] : memref<8x128xf32, #tpu.memory_space<vmem>>, vector<8x128xf32>
    %10 = arith.mulf %3, %3 : vector<8x128xf32>
    %c0_10 = arith.constant 0 : index
    %c0_11 = arith.constant 0 : index
    %11 = vector.load %arg5[%c0_10, %c0_11] : memref<128x128xf32, #tpu.memory_space<vmem>>, vector<128x128xf32>
    %cst_12 = arith.constant dense<0.000000e+00> : vector<8x128xf32>
    %12 = tpu.matmul %10, %11, %cst_12 {dimension_numbers = #tpu.dot_dimension_numbers<[1], [0], [0], [1], [0, 0, 1, 1], [], []>} : vector<8x128xf32>, vector<128x128xf32>, vector<8x128xf32> -> vector<8x128xf32>
    %13 = arith.addf %9, %12 : vector<8x128xf32>
    %c0_13 = arith.constant 0 : index
    %c0_14 = arith.constant 0 : index
    %14 = vector.load %arg11[%c0_13, %c0_14] : memref<8x128xf32, #tpu.memory_space<vmem>>, vector<8x128xf32>
    tpu.vector_store %arg11[%c0_13, %c0_14], %13 {strides = array<i32>} : memref<8x128xf32, #tpu.memory_space<vmem>>, vector<8x128xf32>,
    %c0_i32_15 = arith.constant 0 : i32
    %15 = arith.cmpi eq, %arg2, %c0_i32_15 : i32
    %16 = arith.extui %15 : i1 to i32
    %c0_i32_16 = arith.constant 0 : i32
    %17 = arith.cmpi ne, %16, %c0_i32_16 : i32
    scf.if %17 {
      %c0_17 = arith.constant 0 : index
      %c0_18 = arith.constant 0 : index
      %18 = vector.load %arg10[%c0_17, %c0_18] : memref<8x128xf32, #tpu.memory_space<vmem>>, vector<8x128xf32>
      %c0_19 = arith.constant 0 : index
      %c0_20 = arith.constant 0 : index
      %19 = vector.load %arg6[%c0_19, %c0_20] : memref<1x128xf32, #tpu.memory_space<vmem>>, vector<1x128xf32>
      %20 = vector.broadcast %19 : vector<1x128xf32> to vector<8x128xf32>
      %21 = arith.addf %18, %20 : vector<8x128xf32>
      %c0_21 = arith.constant 0 : index
      %c0_22 = arith.constant 0 : index
      %22 = vector.load %arg11[%c0_21, %c0_22] : memref<8x128xf32, #tpu.memory_space<vmem>>, vector<8x128xf32>
      %c0_23 = arith.constant 0 : index
      %c0_24 = arith.constant 0 : index
      %23 = vector.load %arg7[%c0_23, %c0_24] : memref<1x128xf32, #tpu.memory_space<vmem>>, vector<1x128xf32>
      %24 = vector.broadcast %23 : vector<1x128xf32> to vector<8x128xf32>
      %25 = arith.addf %22, %24 : vector<8x128xf32>
      %26 = math.sqrt %25 : vector<8x128xf32>
      %c0_25 = arith.constant 0 : index
      %c0_26 = arith.constant 0 : index
      %27 = vector.load %arg8[%c0_25, %c0_26] : memref<8x128xf32, #tpu.memory_space<vmem>>, vector<8x128xf32>
      %28 = arith.mulf %26, %27 : vector<8x128xf32>
      %29 = arith.addf %21, %28 : vector<8x128xf32>
      %c0_27 = arith.constant 0 : index
      %c0_28 = arith.constant 0 : index
      %30 = vector.load %arg9[%c0_27, %c0_28] : memref<8x128xf32, #tpu.memory_space<vmem>>, vector<8x128xf32>
      tpu.vector_store %arg9[%c0_27, %c0_28], %29 {strides = array<i32>} : memref<8x128xf32, #tpu.memory_space<vmem>>, vector<8x128xf32>,
    } else {
    }
    return
  }
  func.func @transform_0(%arg0: i32, %arg1: i32, %arg2: i32) -> (i32, i32) {
    %c0_i32 = arith.constant 0 : i32
    return %arg0, %arg2 : i32, i32
  }
  func.func @transform_1(%arg0: i32, %arg1: i32, %arg2: i32) -> (i32, i32) {
    %c0_i32 = arith.constant 0 : i32
    return %arg2, %arg1 : i32, i32
  }
  func.func @transform_2(%arg0: i32, %arg1: i32, %arg2: i32) -> (i32, i32) {
    %c0_i32 = arith.constant 0 : i32
    return %arg2, %arg1 : i32, i32
  }
  func.func @transform_3(%arg0: i32, %arg1: i32, %arg2: i32) -> (i32, i32) {
    %c0_i32 = arith.constant 0 : i32
    %c0_i32_0 = arith.constant 0 : i32
    return %c0_i32, %arg1 : i32, i32
  }
  func.func @transform_4(%arg0: i32, %arg1: i32, %arg2: i32) -> (i32, i32) {
    %c0_i32 = arith.constant 0 : i32
    %c0_i32_0 = arith.constant 0 : i32
    return %c0_i32, %arg1 : i32, i32
  }
  func.func @transform_5(%arg0: i32, %arg1: i32, %arg2: i32) -> (i32, i32) {
    %c0_i32 = arith.constant 0 : i32
    return %arg0, %arg1 : i32, i32
  }
  func.func @transform_6(%arg0: i32, %arg1: i32, %arg2: i32) -> (i32, i32) {
    %c0_i32 = arith.constant 0 : i32
    return %arg0, %arg1 : i32, i32
  }
}

</mosaic_0001>

<bundles_post_ra>
// kernel: bayesian_linear_forward.1
= control target key start
LH: loop header
LB: loop body
LE: loop exit
PB: predicated region body
PF: predicated region fallthrough
CT: control target
= control target key end

     0   :  { %v440_v3 = vmov 0.0|0.0   ;;  %vm441_vm0 = vmmov 0   ;;  %v442_v7 = vmov 0.0   ;;  %s615_s0 = inlined_call_operand.vmem [shape: f32[8,128], index: 0, kind: input, shape index: {}]   ;;  %s616_s1 = inlined_call_operand.vmem [shape: f32[128,128], index: 1, kind: input, shape index: {}]   ;;  %s617_s2 = inlined_call_operand.vmem [shape: f32[128,128], index: 2, kind: input, shape index: {}]   ;;  %s618_s3 = inlined_call_operand.vmem [shape: f32[1,128], index: 3, kind: input, shape index: {}]   ;;  %s619_s4 = inlined_call_operand.vmem [shape: f32[1,128], index: 4, kind: input, shape index: {}]   ;;  %s620_s5 = inlined_call_operand.vmem [shape: f32[8,128], index: 5, kind: input, shape index: {}]   ;;  %s621_s6 = inlined_call_operand.hbm [shape: f32[8,128], index: 6, kind: output, shape index: {}]  }
   0x1   :  { %v122_v0 = vld [vmem:[%s617_s2] sm:$0xff]  ;;  %v123_v1 = vld [vmem:[%s617_s2 + $0x8] sm:$0xff]  ;;  %v124_v2 = vld [vmem:[%s617_s2 + $0x10] sm:$0xff]  ;;  %386 = vmatprep.subr.bf16.mxu1 %v440_v3  ;;  %362 = vmatprep.subr.bf16.mxu0 %v440_v3 }
   0x2   :  { %v387_v4 = vpack.c.bf16 %v123_v1, %v122_v0  ;;  %v125_v5 = vld [vmem:[%s617_s2 + $0x18] sm:$0xff]  ;;  %v32_v6 = vld [vmem:[%s616_s1] sm:$0xff]  ;;  %359 = vmatprep.mubr.msk.f32.mxu1 %vm441_vm0, %v442_v7  ;;  %324 = vmatprep.mubr.msk.f32.mxu0 %vm441_vm0, %v442_v7  ;;  %v33_v10 = vld [vmem:[%s616_s1 + $0x8] sm:$0xff] }
   0x3   :  { %v390_v8 = vpack.c.bf16 %v125_v5, %v124_v2  ;;  %v126_v9 = vld [vmem:[%s617_s2 + $0x20] sm:$0xff]  ;;  %v127_v11 = vld [vmem:[%s617_s2 + $0x28] sm:$0xff]  ;;  %v363_v12 = vpack.c.bf16 %v33_v10, %v32_v6  ;;  %v34_v13 = vld [vmem:[%s616_s1 + $0x10] sm:$0xff] }
   0x4   :  { %388 = vmatpush3.bf16.msra.mxu1 %v387_v4  ;;  %v35_v14 = vld [vmem:[%s616_s1 + $0x18] sm:$0xff]  ;;  %v393_v16 = vpack.c.bf16 %v127_v11, %v126_v9  ;;  %v36_v17 = vld [vmem:[%s616_s1 + $0x20] sm:$0xff]  ;;  %v37_v18 = vld [vmem:[%s616_s1 + $0x28] sm:$0xff] }
   0x5   :  { %389 = vmatprep.subr.bf16.mxu1 %v440_v3  ;;  %364 = vmatpush3.bf16.msra.mxu0 %v363_v12  ;;  %v366_v15 = vpack.c.bf16 %v35_v14, %v34_v13  ;;  %v128_v19 = vld [vmem:[%s617_s2 + $0x30] sm:$0xff]  ;;  %v129_v20 = vld [vmem:[%s617_s2 + $0x38] sm:$0xff]  ;;  %v369_v21 = vpack.c.bf16 %v37_v18, %v36_v17 }
   0x6   :  { %365 = vmatprep.subr.bf16.mxu0 %v440_v3  ;;  %v396_v22 = vpack.c.bf16 %v129_v20, %v128_v19  ;;  %v38_v23 = vld [vmem:[%s616_s1 + $0x30] sm:$0xff]  ;;  %v39_v24 = vld [vmem:[%s616_s1 + $0x38] sm:$0xff] }
   0x8   :  { %391 = vmatpush3.bf16.msra.mxu1 %v390_v8 }
   0x9   :  { %392 = vmatprep.subr.bf16.mxu1 %v440_v3  ;;  %367 = vmatpush3.bf16.msra.mxu0 %v366_v15 }
   0xa   :  { %368 = vmatprep.subr.bf16.mxu0 %v440_v3 }
   0xc   :  { %394 = vmatpush3.bf16.msra.mxu1 %v393_v16 }
   0xd   :  { %11 = vsyncpa [#allocation5], 0  ;;  %395 = vmatprep.subr.bf16.mxu1 %v440_v3  ;;  %v130_v25 = vld [vmem:[%s617_s2 + $0x40] sm:$0xff]  ;;  %v131_v26 = vld [vmem:[%s617_s2 + $0x48] sm:$0xff]  ;;  %370 = vmatpush3.bf16.msra.mxu0 %v369_v21  ;;  %v372_v27 = vpack.c.bf16 %v39_v24, %v38_v23 }
   0xe   :  { %v399_v28 = vpack.c.bf16 %v131_v26, %v130_v25  ;;  %371 = vmatprep.subr.bf16.mxu0 %v440_v3  ;;  %v40_v29 = vld [vmem:[%s616_s1 + $0x40] sm:$0xff]  ;;  %v41_v30 = vld [vmem:[%s616_s1 + $0x48] sm:$0xff]  ;;  %v132_v31 = vld [vmem:[%s617_s2 + $0x50] sm:$0xff] }
   0xf   :  { %v133_v32 = vld [vmem:[%s617_s2 + $0x58] sm:$0xff]  ;;  %v375_v33 = vpack.c.bf16 %v41_v30, %v40_v29  ;;  %v42_v35 = vld [vmem:[%s616_s1 + $0x50] sm:$0xff]  ;;  %v134_v37 = vld [vmem:[%s617_s2 + $0x60] sm:$0xff] }
  0x10   :  { %397 = vmatpush3.bf16.msra.mxu1 %v396_v22  ;;  %v402_v34 = vpack.c.bf16 %v133_v32, %v132_v31  ;;  %v43_v36 = vld [vmem:[%s616_s1 + $0x58] sm:$0xff]  ;;  %v135_v38 = vld [vmem:[%s617_s2 + $0x68] sm:$0xff]  ;;  %v44_v41 = vld [vmem:[%s616_s1 + $0x60] sm:$0xff] }
  0x11   :  { %398 = vmatprep.subr.bf16.mxu1 %v440_v3  ;;  %373 = vmatpush3.bf16.msra.mxu0 %v372_v27  ;;  %v378_v39 = vpack.c.bf16 %v43_v36, %v42_v35  ;;  %v405_v40 = vpack.c.bf16 %v135_v38, %v134_v37  ;;  %v45_v42 = vld [vmem:[%s616_s1 + $0x68] sm:$0xff]  ;;  %v136_v43 = vld [vmem:[%s617_s2 + $0x70] sm:$0xff]  ;;  %v137_v44 = vld [vmem:[%s617_s2 + $0x78] sm:$0xff] }
  0x12   :  { %374 = vmatprep.subr.bf16.mxu0 %v440_v3  ;;  %v381_v45 = vpack.c.bf16 %v45_v42, %v44_v41  ;;  %v408_v46 = vpack.c.bf16 %v137_v44, %v136_v43  ;;  %v30_v47 = vld [vmem:[%s615_s0] sm:$0xff]  ;;  %v46_v48 = vld [vmem:[%s616_s1 + $0x70] sm:$0xff]  ;;  %v47_v49 = vld [vmem:[%s616_s1 + $0x78] sm:$0xff] }
  0x13   :  { %v121_v50 = vmul.f32 %v30_v47, %v30_v47  ;;  %v384_v51 = vpack.c.bf16 %v47_v49, %v46_v48  ;;  %v257_v52 = vld [vmem:[%s619_s4] ss:$0 sm:$0xff]  ;;  %s443_s4 = smov [#allocation4]  }
  0x14   :  { %400 = vmatpush3.bf16.msra.mxu1 %v399_v28  ;;  %v256_v59 = vld [vmem:[%s618_s3] ss:$0 sm:$0xff]  ;;  %s248_s18 = sshll.u32 %s443_s4, 4  ;;  %s249_s18 = int_to_ptr.vmem [resolvable:$true] %s248_s18 }
  0x15   :  { %401 = vmatprep.subr.bf16.mxu1 %v440_v3  ;;  %376 = vmatpush3.bf16.msra.mxu0 %v375_v33  ;;  %v238_v62 = vld [vmem:[%s620_s5] sm:$0xff]  ;;  %s416_s19 = scalar_lea.vmem %s249_s18, 128  ;;  %p421_p1 = scmp.lt.s32.totalorder %s249_s18, %s249_s18 }
  0x16   :  { %377 = vmatprep.subr.bf16.mxu0 %v440_v3  ;;  %p417_p0 = scmp.ne.s32.totalorder %s249_s18, %s416_s19  ;;  %p422_p2 = scmp.lt.s32.totalorder %s416_s19, %s416_s19 }
  0x18   :  { %403 = vmatpush3.bf16.msra.mxu1 %v402_v34  ;;  %p423_p3 = por %p422_p2, %p421_p1 }
  0x19   :  { %404 = vmatprep.subr.bf16.mxu1 %v440_v3  ;;  %379 = vmatpush3.bf16.msra.mxu0 %v378_v39 }
  0x1a   :  { %380 = vmatprep.subr.bf16.mxu0 %v440_v3  ;;  %p424_p4 = pnand %p423_p3, %p417_p0 }
  0x1c   :  { %406 = vmatpush3.bf16.msra.mxu1 %v405_v40 }
  0x1d   :  { %407 = vmatprep.subr.bf16.mxu1 %v440_v3  ;;  %382 = vmatpush3.bf16.msra.mxu0 %v381_v45 }
  0x1e   :  { %383 = vmatprep.subr.bf16.mxu0 %v440_v3 }
  0x20   :  { %409 = vmatpush3.bf16.msra.mxu1 %v408_v46 }
  0x21   :  { %385 = vmatpush3.bf16.msra.mxu0 %v384_v51 }
  0x23   :  { %360 = vmatmul.mubr.f32.vlgmr.msra.gmra.mrb[0].mxu1 %v121_v50 }
  0x24   :  { %325 = vmatmul.mubr.f32.vlgmr.msra.gmra.mrb[0].mxu0 %v30_v47 }
  0xf6   :  { %v204_v53 = vpop.f32.mrb[0].mxu1 }
  0xf7   :  { %v230_v54 = vadd.f32 %v257_v52, %v204_v53  ;;  %v361_v55 = vpop.f32.mrb[1].mxu1  ;;  %v114_v56 = vpop.f32.mrb[0].mxu0 }
  0xf8   :  { %v326_v57 = vpop.f32.mrb[1].mxu0  ;;  %v221_v63 = vadd.f32 %v256_v59, %v114_v56 }
  0xf9   :  { %414 = vrsqrt.f32 %v230_v54  ;;  %vm233_vm1 = vcmp.eq.f32.partialorder %v230_v54, inf  ;;  %v236_v61 = vand.u32 2147483648, %v230_v54  ;;  %vm235_vm2 = vcmp.eq.f32.partialorder %v230_v54, 0.0 }
 0x103   :  { %v415_v58 = vpop.eup %414 }
 0x104   :  { %v232_v60 = vmul.f32 %v415_v58, %v230_v54 }
 0x106   :  { %v234_v0 = vsel %vm233_vm1, %v230_v54, %v232_v60 }
 0x107   :  { %v237_v1 = vsel %vm235_vm2, %v236_v61, %v234_v0 }
 0x108   :  { %v239_v2 = vmul.f32 %v238_v62, %v237_v1 }
 0x10a   :  { %v240_v3 = vadd.f32 %v239_v2, %v221_v63 }
 0x10c   :  { %241 = vst [vmem:[#allocation4] sm:$0xff] %v240_v3 }
 0x10d   :  { %427 = shalt.err (!%p424_p4)
}
 0x10e   :  { %s428_s5 = scalar_lea.hbm %s621_s6, 128 }
 0x10f   :  { %p429_p5 = scmp.ne.s32.totalorder %s621_s6, %s428_s5  ;;  %p432_p6 = scmp.lt.u32.totalorder %s428_s5, %s621_s6 }
 0x111   :  { %p434_p7 = pnand %p432_p6, %p429_p5 }
 0x113   :  { %437 = shalt.err (!%p434_p7)
}
 0x114   :  { %251 = dma.vmem_to_hbm [thread:$0]  %s249_s18, 128, %s621_s6, [#allocation5]  }
 0x115   :  { %438 = dma.done.wait [#allocation5], 128  }
 0x116   :  { %439 = vsyncadd [#allocation5], 4294967168 }
 0x117   :  { %255 = vsyncpa [#allocation5], 1 }

</bundles_post_ra>
